<compile_context>
chip_gen: v5e
topology: v5e:2x2
jax: 0.10.0
libtpu: 0.0.40
codegen_flags: <defaults>
</compile_context>

<pallas_src>
import math

import jax
import jax.numpy as jnp
from jax.experimental import pallas as pl
from jax.experimental.pallas import tpu as pltpu


def _add_kernel(a_ref, b_ref, o_ref):
    o_ref[...] = a_ref[...] + b_ref[...]


def pallas_add(a, b):
    assert a.shape == b.shape and a.dtype == b.dtype
    orig_shape = a.shape
    total = math.prod(orig_shape)

    LANE = 128
    if total % LANE != 0:
        # TODO(synk): a non-128-multiple total would need an in-kernel masked tail
        # block (pltpu.store with a lane mask); never triggers for this module's
        # shape, so fall back to the fused XLA add rather than padding in HBM.
        return a + b

    # Pick the number of 128-lane column tiles (= grid steps): prefer >= 2 for
    # pipelining and v7x dual-TC sharding, as many as divide cleanly.
    n_tiles = 1
    for n in (8, 4, 2):
        if total % (LANE * n) == 0:
            n_tiles = n
            break
    width = LANE * n_tiles          # e.g. 512 for this shape
    rows = total // width           # e.g. 245 (full leading dim -> (8,128)-rule exempt)

    a2 = a.reshape(rows, width)
    b2 = b.reshape(rows, width)

    out2 = pl.pallas_call(
        _add_kernel,
        out_shape=jax.ShapeDtypeStruct((rows, width), a.dtype),
        grid_spec=pltpu.PrefetchScalarGridSpec(
            num_scalar_prefetch=0,
            grid=(n_tiles,),
            in_specs=[
                pl.BlockSpec((rows, LANE), lambda i: (0, i)),
                pl.BlockSpec((rows, LANE), lambda i: (0, i)),
            ],
            out_specs=pl.BlockSpec((rows, LANE), lambda i: (0, i)),
        ),
        # Result overwrites input 0's buffer (a fresh reshape temp) — no new HBM alloc.
        input_output_aliases={0: 0},
        compiler_params=pltpu.CompilerParams(
            dimension_semantics=("parallel",),
        ),
    )(a2, b2)

    return out2.reshape(orig_shape)


if __name__ == "__main__":
    key = jax.random.PRNGKey(0)
    k1, k2 = jax.random.split(key)
    # Shapes implied by the module's forward: [1, 40, 56, 56]
    x84 = jax.random.normal(k1, (1, 40, 56, 56), dtype=jnp.float32)
    x70 = jax.random.normal(k2, (1, 40, 56, 56), dtype=jnp.float32)

    # Reference computed first (kernel donates its reshaped copy of input 0).
    ref = x84 + x70

    out = pallas_add(x84, x70)
    jax.block_until_ready(out)

    assert out.shape == ref.shape
    assert jnp.allclose(out, ref, atol=1e-6, rtol=1e-6)
    print("KERNEL_OK")
</pallas_src>

<mosaic_0001>
module attributes {stable_mosaic.version = 11 : i64} {
  func.func @_add_kernel(%arg0: i32, %arg1: memref<245x128xf32, #tpu.memory_space<vmem>>, %arg2: memref<245x128xf32, #tpu.memory_space<vmem>>, %arg3: memref<245x128xf32, #tpu.memory_space<vmem>>) attributes {dimension_semantics = [#tpu.dimension_semantics<parallel>], iteration_bounds = array<i64: 4>, scalar_prefetch = 0 : i64, scratch_operands = 0 : i64, tpu.core_type = #tpu.core_type<tc>, window_params = [{transform_indices = @transform_0, window_bounds = array<i64: 245, 128>}, {transform_indices = @transform_1, window_bounds = array<i64: 245, 128>}, {transform_indices = @transform_2, window_bounds = array<i64: 245, 128>}]} {
    %c0 = arith.constant 0 : index
    %c0_0 = arith.constant 0 : index
    %0 = vector.load %arg1[%c0, %c0_0] : memref<245x128xf32, #tpu.memory_space<vmem>>, vector<245x128xf32>
    %c0_1 = arith.constant 0 : index
    %c0_2 = arith.constant 0 : index
    %1 = vector.load %arg2[%c0_1, %c0_2] : memref<245x128xf32, #tpu.memory_space<vmem>>, vector<245x128xf32>
    %2 = arith.addf %0, %1 : vector<245x128xf32>
    %c0_3 = arith.constant 0 : index
    %c0_4 = arith.constant 0 : index
    %3 = vector.load %arg3[%c0_3, %c0_4] : memref<245x128xf32, #tpu.memory_space<vmem>>, vector<245x128xf32>
    tpu.vector_store %arg3[%c0_3, %c0_4], %2 {strides = array<i32>} : memref<245x128xf32, #tpu.memory_space<vmem>>, vector<245x128xf32>,
    return
  }
  func.func @transform_0(%arg0: i32) -> (i32, i32) {
    %c0_i32 = arith.constant 0 : i32
    %c0_i32_0 = arith.constant 0 : i32
    return %c0_i32, %arg0 : i32, i32
  }
  func.func @transform_1(%arg0: i32) -> (i32, i32) {
    %c0_i32 = arith.constant 0 : i32
    %c0_i32_0 = arith.constant 0 : i32
    return %c0_i32, %arg0 : i32, i32
  }
  func.func @transform_2(%arg0: i32) -> (i32, i32) {
    %c0_i32 = arith.constant 0 : i32
    %c0_i32_0 = arith.constant 0 : i32
    return %c0_i32, %arg0 : i32, i32
  }
}

</mosaic_0001>

<bundles_post_ra>
// kernel: tpu_custom_call.1
= control target key start
LH: loop header
LB: loop body
LE: loop exit
PB: predicated region body
PF: predicated region fallthrough
CT: control target
= control target key end

     0   :  { %7 = vsyncpa [#allocation3], 0  ;;  %s1034_s0 = inlined_call_operand.hbm [shape: f32[245,512], index: 0, kind: input, shape index: {}, may-alias: {0,2}]   ;;  %s1035_s1 = inlined_call_operand.vmem [shape: f32[245,512], index: 1, kind: input, shape index: {}]   ;;  %s1036_s2 = inlined_call_operand.hbm [shape: f32[245,512], index: 2, kind: output, shape index: {}, may-alias: {0,2}]  }
   0x1   :  { %9 = vsyncpa [#allocation3 + $0x1], 0 }
   0x2   :  { %10 = vsyncpa [#allocation4], 0 }
   0x3   :  { %12 = vsyncpa [#allocation4 + $0x1], 0  ;;  %s744_s9 = smov 0   ;;  %s746_s10 = smov 0  }
   0x4   :  { %s748_s11 = smov 0   ;;  %s750_s12 = smov 0  }
   0x5 LB: > { %s765_s13 = sadd.s32 4294967295, %s721_s12   ;;  %s568_s14 = sadd.s32 4294967294, %s721_s12   ;;  %s721_s12 = sphi %s750_s12, %s1044_s12   ;;  %s717_s11 = sphi %s748_s11, %s1043_s11   ;;  %s713_s10 = sphi %s746_s10, %s1042_s10   ;;  %s709_s9 = sphi %s744_s9, %s1041_s9  }
   0x6   : > { %s769_s15 = sadd.s32 1, %s721_s12   ;;  %s25_s16 = sadd.s32 1, %s717_s11 }
   0x7   : > { %s22_s17 = ssub.s32 %s721_s12, %s769_s15  ;;  %p32_p0 = scmp.ne.s32.totalorder %s717_s11, %s713_s10 }
   0x8   : > { %p23_p1 = scmp.eq.s32.totalorder %s22_s17, 0  ;;  %p33_p2 = scmp.eq.s32.totalorder %s721_s12, 0 }
   0x9   : > { %p38_p3 = scmp.ne.s32.totalorder %s713_s10, %s709_s9  ;;  %p39_p4 = scmp.eq.s32.totalorder %s765_s13, 0 }
   0xa   : > { %s781_s18 = scalar_select %p23_p1, %s717_s11, %s25_s16  }
   0xb   : > { %p783_p5 = por %p33_p2, %p32_p0  ;;  %p787_p6 = por %p39_p4, %p38_p3 }
   0xc   : > { %p88_p7 = scmp.eq.s32.totalorder %s765_s13, 3  ;;  %p94_p8 = scmp.eq.s32.totalorder %s568_s14, 3 }
   0xd   : > { %p570_p11 = scmp.ge.s32.totalorder %s721_s12, 4 }
   0xe   : > { %p792_p9 = por %p88_p7, %p32_p0  ;;  %p796_p10 = por %p94_p8, %p38_p3 }
   0xf   : > { %110 = sbr.rel (%p570_p11) target bundleno = 66 (0x42), region = 16  ;;  %s114_s23 = sand.u32 (!%p570_p11), 1, %s717_s11  }
  0x10   : > { %s571_s24 = sshll.u32 (!%p570_p11), %s721_s12, 3  ;;  %s577_s25 = smul.u32 (!%p570_p11), 248, %s114_s23 }
  0x11   : > { %s122_s28 = scalar_lea.hbm (!%p570_p11), %s1034_s0, %s571_s24  ;;  %s115_s4 = scalar_lea.sflag (!%p570_p11), [#allocation3], %s114_s23 }
  0x12   : > { %s123_s29 = sshll.u32 (!%p570_p11), %s122_s28, 4  ;;  %s118_s30 = scalar_lea.vmem (!%p570_p11), [#allocation2], %s577_s25  ;;  %s124_s29 = int_to_ptr.hbm [resolvable:$true] %s123_s29 }
  0x13   : > { %s125_s3 = sshll.u32 (!%p570_p11), %s118_s30, 4  ;;  %s627_s5 = sshra.s32 (!%p570_p11), %s124_s29, 4  ;;  %s126_s3 = int_to_ptr.vmem [resolvable:$true] %s125_s3  ;;  %s628_s5 = int_to_ptr.hbm [resolvable:$true] %s627_s5 }
  0x14   : > { %s629_s6 = scalar_lea.hbm %s628_s5, 248  ;;  %s633_s14 = scalar_lea.hbm %s1034_s0, 992 }
  0x15   : > { %p630_p12 = scmp.ne.s32.totalorder %s628_s5, %s629_s6  ;;  %p634_p1 = scmp.lt.s32.totalorder %s628_s5, %s1034_s0 }
  0x16   : > { %p635_p2 = scmp.lt.s32.totalorder %s633_s14, %s629_s6 }
  0x17   : > { %p631_p13 = pnand %p630_p12, %p783_p5 }
  0x18   : > { %p636_p3 = por %p635_p2, %p634_p1 }
  0x19   : > { %p632_p0 = pneg %p631_p13 }
  0x1b   : > { %p637_p4 = pnand %p636_p3, %p632_p0 }
  0x1d   : > { %640 = shalt.err (!%p637_p4)
}
  0x1e   : > { %s723_s23 = smov 512   ;;  %s724_s26 = smov 128  }
  0x1f   : > { %s725_s27 = smov 8   ;;  %134 = sbr.rel (!%p783_p5) target bundleno = 66 (0x42), region = 24 }
  0x20   : > { %580 = dma.hbm_to_vmem [thread:$0]  (%p783_p5), %s124_s29, 3968, %s126_s3, %s115_s4, %s723_s23, %s724_s26, %s725_s27  }
  0x21   : > { %s825_s7 = scalar_lea.vmem (%p783_p5), %s1035_s1, %s571_s24  ;;  %s830_s19 = scalar_lea.vmem (%p783_p5), [#allocation5], %s577_s25 }
  0x22   : > { %v229_v0 = vld [vmem:[%s825_s7] sm:$0xff] (%p783_p5) }
  0x23   : > { %v231_v1 = vld [vmem:[%s825_s7 + $0x20] sm:$0xff] (%p783_p5)  ;;  %230 = vst [vmem:[%s830_s19] sm:$0xff] (%p783_p5), %v229_v0 }
  0x24   : > { %v233_v2 = vld [vmem:[%s825_s7 + $0x40] sm:$0xff]  ;;  %232 = vst [vmem:[%s830_s19 + $0x8] sm:$0xff] %v231_v1 }
  0x25   : > { %v235_v3 = vld [vmem:[%s825_s7 + $0x60] sm:$0xff]  ;;  %234 = vst [vmem:[%s830_s19 + $0x10] sm:$0xff] %v233_v2 }
  0x26   : > { %v237_v4 = vld [vmem:[%s825_s7 + $0x80] sm:$0xff]  ;;  %236 = vst [vmem:[%s830_s19 + $0x18] sm:$0xff] %v235_v3 }
  0x27   : > { %v239_v5 = vld [vmem:[%s825_s7 + $0xa0] sm:$0xff]  ;;  %238 = vst [vmem:[%s830_s19 + $0x20] sm:$0xff] %v237_v4 }
  0x28   : > { %v241_v6 = vld [vmem:[%s825_s7 + $0xc0] sm:$0xff]  ;;  %240 = vst [vmem:[%s830_s19 + $0x28] sm:$0xff] %v239_v5 }
  0x29   : > { %v243_v7 = vld [vmem:[%s825_s7 + $0xe0] sm:$0xff]  ;;  %242 = vst [vmem:[%s830_s19 + $0x30] sm:$0xff] %v241_v6 }
  0x2a   : > { %v245_v8 = vld [vmem:[%s825_s7 + $0x100] sm:$0xff]  ;;  %244 = vst [vmem:[%s830_s19 + $0x38] sm:$0xff] %v243_v7 }
  0x2b   : > { %v247_v9 = vld [vmem:[%s825_s7 + $0x120] sm:$0xff]  ;;  %246 = vst [vmem:[%s830_s19 + $0x40] sm:$0xff] %v245_v8 }
  0x2c   : > { %v249_v10 = vld [vmem:[%s825_s7 + $0x140] sm:$0xff]  ;;  %248 = vst [vmem:[%s830_s19 + $0x48] sm:$0xff] %v247_v9 }
  0x2d   : > { %v251_v11 = vld [vmem:[%s825_s7 + $0x160] sm:$0xff]  ;;  %250 = vst [vmem:[%s830_s19 + $0x50] sm:$0xff] %v249_v10 }
  0x2e   : > { %v253_v12 = vld [vmem:[%s825_s7 + $0x180] sm:$0xff]  ;;  %252 = vst [vmem:[%s830_s19 + $0x58] sm:$0xff] %v251_v11 }
  0x2f   : > { %v255_v13 = vld [vmem:[%s825_s7 + $0x1a0] sm:$0xff]  ;;  %254 = vst [vmem:[%s830_s19 + $0x60] sm:$0xff] %v253_v12 }
  0x30   : > { %v257_v14 = vld [vmem:[%s825_s7 + $0x1c0] sm:$0xff]  ;;  %256 = vst [vmem:[%s830_s19 + $0x68] sm:$0xff] %v255_v13 }
  0x31   : > { %v259_v15 = vld [vmem:[%s825_s7 + $0x1e0] sm:$0xff]  ;;  %258 = vst [vmem:[%s830_s19 + $0x70] sm:$0xff] %v257_v14 }
  0x32   : > { %v261_v16 = vld [vmem:[%s825_s7 + $0x200] sm:$0xff]  ;;  %260 = vst [vmem:[%s830_s19 + $0x78] sm:$0xff] %v259_v15 }
  0x33   : > { %v263_v17 = vld [vmem:[%s825_s7 + $0x220] sm:$0xff]  ;;  %262 = vst [vmem:[%s830_s19 + $0x80] sm:$0xff] %v261_v16 }
  0x34   : > { %v265_v18 = vld [vmem:[%s825_s7 + $0x240] sm:$0xff]  ;;  %264 = vst [vmem:[%s830_s19 + $0x88] sm:$0xff] %v263_v17 }
  0x35   : > { %v267_v19 = vld [vmem:[%s825_s7 + $0x260] sm:$0xff]  ;;  %266 = vst [vmem:[%s830_s19 + $0x90] sm:$0xff] %v265_v18 }
  0x36   : > { %v269_v20 = vld [vmem:[%s825_s7 + $0x280] sm:$0xff]  ;;  %268 = vst [vmem:[%s830_s19 + $0x98] sm:$0xff] %v267_v19 }
  0x37   : > { %v271_v21 = vld [vmem:[%s825_s7 + $0x2a0] sm:$0xff]  ;;  %270 = vst [vmem:[%s830_s19 + $0xa0] sm:$0xff] %v269_v20 }
  0x38   : > { %v273_v22 = vld [vmem:[%s825_s7 + $0x2c0] sm:$0xff]  ;;  %272 = vst [vmem:[%s830_s19 + $0xa8] sm:$0xff] %v271_v21 }
  0x39   : > { %v275_v23 = vld [vmem:[%s825_s7 + $0x2e0] sm:$0xff]  ;;  %274 = vst [vmem:[%s830_s19 + $0xb0] sm:$0xff] %v273_v22 }
  0x3a   : > { %v277_v24 = vld [vmem:[%s825_s7 + $0x300] sm:$0xff]  ;;  %276 = vst [vmem:[%s830_s19 + $0xb8] sm:$0xff] %v275_v23 }
  0x3b   : > { %v279_v25 = vld [vmem:[%s825_s7 + $0x320] sm:$0xff]  ;;  %278 = vst [vmem:[%s830_s19 + $0xc0] sm:$0xff] %v277_v24 }
  0x3c   : > { %v281_v26 = vld [vmem:[%s825_s7 + $0x340] sm:$0xff]  ;;  %280 = vst [vmem:[%s830_s19 + $0xc8] sm:$0xff] %v279_v25 }
  0x3d   : > { %v283_v27 = vld [vmem:[%s825_s7 + $0x360] sm:$0xff]  ;;  %282 = vst [vmem:[%s830_s19 + $0xd0] sm:$0xff] %v281_v26 }
  0x3e   : > { %v285_v28 = vld [vmem:[%s825_s7 + $0x380] sm:$0xff]  ;;  %284 = vst [vmem:[%s830_s19 + $0xd8] sm:$0xff] %v283_v27 }
  0x3f   : > { %v287_v29 = vld [vmem:[%s825_s7 + $0x3a0] sm:$0xff]  ;;  %286 = vst [vmem:[%s830_s19 + $0xe0] sm:$0xff] %v285_v28 }
  0x40   : > { %v289_v30 = vld [vmem:[%s825_s7 + $0x3c0] sm:$0xff]  ;;  %288 = vst [vmem:[%s830_s19 + $0xe8] sm:$0xff] %v287_v29 }
  0x41   : > { %290 = vst [vmem:[%s830_s19 + $0xf0] sm:$0xff] %v289_v30 }
  0x42 PF: > { %p573_p5 = scmp.ge.s32.totalorder %s721_s12, 1  ;;  %p295_p7 = scmp.lt.s32.totalorder %s721_s12, 5 }
  0x44   : > { %p296_p8 = pnand %p573_p5, %p295_p7 }
  0x45   : > { %s894_s24 = sand.u32 (!%p296_p8), 1, %s713_s10  }
  0x46   : > { %299 = sbr.rel (%p296_p8) target bundleno = 115 (0x73), region = 62  ;;  %s302_s29 = scalar_lea.sflag (!%p296_p8), [#allocation3], %s894_s24 }
  0x47   : > { %s579_s25 = smul.u32 (!%p296_p8), 248, %s894_s24 }
  0x49   : > { %s898_s3 = scalar_lea.vmem (!%p296_p8), [#allocation2], %s579_s25 }
  0x4b   : > { %700 = dma.done.wait (%p787_p6), %s302_s29, 3968  }
  0x4c   : > { %702 = vsyncadd (%p787_p6), %s302_s29, 4294963328  ;;  %v338_v31 = vld [vmem:[%s898_s3] sm:$0xff]  ;;  %s905_s4 = scalar_lea.vmem [#allocation5], %s579_s25  ;;  %v339_v33 = vld [vmem:[%s898_s3 + $0x8] sm:$0xff]  ;;  %s915_s20 = scalar_lea.vmem [#allocation6], %s579_s25 }
  0x4d   : > { %v369_v32 = vld [vmem:[%s905_s4] sm:$0xff]  ;;  %v370_v35 = vld [vmem:[%s905_s4 + $0x8] sm:$0xff]  ;;  %v371_v37 = vld [vmem:[%s905_s4 + $0x10] sm:$0xff]  ;;  %s574_s5 = sshll.u32 %s765_s13, 3  ;;  %s474_s14 = sshll.u32 %s915_s20, 4  ;;  %s475_s14 = int_to_ptr.vmem [resolvable:$true] %s474_s14 }
  0x4e   : > { %v400_v34 = vadd.f32 %v369_v32, %v338_v31  ;;  %v340_v36 = vld [vmem:[%s898_s3 + $0x10] sm:$0xff]  ;;  %v401_v38 = vadd.f32 %v370_v35, %v339_v33  ;;  %v341_v40 = vld [vmem:[%s898_s3 + $0x18] sm:$0xff]  ;;  %v372_v41 = vld [vmem:[%s905_s4 + $0x18] sm:$0xff]  ;;  %s473_s8 = scalar_lea.hbm %s1036_s2, %s574_s5  ;;  %s463_s17 = scalar_lea.sflag [#allocation4], %s894_s24 }
  0x4f   : > { %v402_v39 = vadd.f32 %v371_v37, %v340_v36  ;;  %v342_v42 = vld [vmem:[%s898_s3 + $0x20] sm:$0xff]  ;;  %v403_v43 = vadd.f32 %v372_v41, %v341_v40  ;;  %v373_v44 = vld [vmem:[%s905_s4 + $0x20] sm:$0xff]  ;;  %v343_v45 = vld [vmem:[%s898_s3 + $0x28] sm:$0xff]  ;;  %s476_s16 = sshll.u32 %s473_s8, 4  ;;  %s675_s30 = scalar_lea.hbm %s1036_s2, 992  ;;  %s477_s16 = int_to_ptr.hbm [resolvable:$true] %s476_s16 }
  0x50   : > { %431 = vst [vmem:[%s915_s20] sm:$0xff] %v400_v34  ;;  %v374_v46 = vld [vmem:[%s905_s4 + $0x28] sm:$0xff]  ;;  %v404_v47 = vadd.f32 %v373_v44, %v342_v42  ;;  %v344_v49 = vld [vmem:[%s898_s3 + $0x30] sm:$0xff]  ;;  %v375_v50 = vld [vmem:[%s905_s4 + $0x30] sm:$0xff]  ;;  %s669_s23 = sshra.s32 %s477_s16, 4  ;;  %s670_s23 = int_to_ptr.hbm [resolvable:$true] %s669_s23 }
  0x51   : > { %432 = vst [vmem:[%s915_s20 + $0x8] sm:$0xff] %v401_v38  ;;  %v405_v48 = vadd.f32 %v374_v46, %v343_v45  ;;  %v345_v51 = vld [vmem:[%s898_s3 + $0x38] sm:$0xff]  ;;  %v406_v52 = vadd.f32 %v375_v50, %v344_v49  ;;  %v376_v53 = vld [vmem:[%s905_s4 + $0x38] sm:$0xff]  ;;  %v346_v54 = vld [vmem:[%s898_s3 + $0x40] sm:$0xff]  ;;  %s671_s26 = scalar_lea.hbm %s670_s23, 248  ;;  %p676_p13 = scmp.lt.s32.totalorder %s670_s23, %s1036_s2 }
  0x52   : > { %433 = vst [vmem:[%s915_s20 + $0x10] sm:$0xff] %v402_v39  ;;  %v377_v55 = vld [vmem:[%s905_s4 + $0x40] sm:$0xff]  ;;  %v407_v56 = vadd.f32 %v376_v53, %v345_v51  ;;  %v347_v57 = vld [vmem:[%s898_s3 + $0x48] sm:$0xff]  ;;  %v378_v58 = vld [vmem:[%s905_s4 + $0x48] sm:$0xff]  ;;  %p672_p6 = scmp.ne.s32.totalorder %s670_s23, %s671_s26  ;;  %p677_p0 = scmp.lt.s32.totalorder %s675_s30, %s671_s26 }
  0x53   : > { %434 = vst [vmem:[%s915_s20 + $0x18] sm:$0xff] %v403_v43  ;;  %v348_v59 = vld [vmem:[%s898_s3 + $0x50] sm:$0xff]  ;;  %v408_v60 = vadd.f32 %v377_v55, %v346_v54  ;;  %v379_v61 = vld [vmem:[%s905_s4 + $0x50] sm:$0xff]  ;;  %v349_v62 = vld [vmem:[%s898_s3 + $0x58] sm:$0xff]  ;;  %v409_v0 = vadd.f32 %v378_v58, %v347_v57 }
  0x54   : > { %435 = vst [vmem:[%s915_s20 + $0x20] sm:$0xff] %v404_v47  ;;  %v380_v63 = vld [vmem:[%s905_s4 + $0x58] sm:$0xff]  ;;  %v350_v1 = vld [vmem:[%s898_s3 + $0x60] sm:$0xff]  ;;  %v381_v2 = vld [vmem:[%s905_s4 + $0x60] sm:$0xff]  ;;  %v410_v3 = vadd.f32 %v379_v61, %v348_v59  ;;  %p673_p11 = pnand %p672_p6, %p792_p9  ;;  %p678_p1 = por %p677_p0, %p676_p13 }
  0x55   : > { %436 = vst [vmem:[%s915_s20 + $0x28] sm:$0xff] %v405_v48  ;;  %v351_v4 = vld [vmem:[%s898_s3 + $0x68] sm:$0xff]  ;;  %v382_v5 = vld [vmem:[%s905_s4 + $0x68] sm:$0xff]  ;;  %v411_v6 = vadd.f32 %v380_v63, %v349_v62  ;;  %v352_v7 = vld [vmem:[%s898_s3 + $0x70] sm:$0xff]  ;;  %v412_v9 = vadd.f32 %v381_v2, %v350_v1 }
  0x56   : > { %437 = vst [vmem:[%s915_s20 + $0x30] sm:$0xff] %v406_v52  ;;  %v383_v8 = vld [vmem:[%s905_s4 + $0x70] sm:$0xff]  ;;  %v353_v10 = vld [vmem:[%s898_s3 + $0x78] sm:$0xff]  ;;  %v384_v11 = vld [vmem:[%s905_s4 + $0x78] sm:$0xff]  ;;  %v413_v12 = vadd.f32 %v382_v5, %v351_v4  ;;  %p674_p12 = pneg %p673_p11 }
  0x57   : > { %438 = vst [vmem:[%s915_s20 + $0x38] sm:$0xff] %v407_v56  ;;  %v354_v13 = vld [vmem:[%s898_s3 + $0x80] sm:$0xff]  ;;  %v385_v14 = vld [vmem:[%s905_s4 + $0x80] sm:$0xff]  ;;  %v414_v15 = vadd.f32 %v383_v8, %v352_v7  ;;  %v355_v16 = vld [vmem:[%s898_s3 + $0x88] sm:$0xff]  ;;  %v415_v18 = vadd.f32 %v384_v11, %v353_v10 }
  0x58   : > { %439 = vst [vmem:[%s915_s20 + $0x40] sm:$0xff] %v408_v60  ;;  %v386_v17 = vld [vmem:[%s905_s4 + $0x88] sm:$0xff]  ;;  %v356_v19 = vld [vmem:[%s898_s3 + $0x90] sm:$0xff]  ;;  %v387_v20 = vld [vmem:[%s905_s4 + $0x90] sm:$0xff]  ;;  %v416_v21 = vadd.f32 %v385_v14, %v354_v13  ;;  %p679_p2 = pnand %p678_p1, %p674_p12 }
  0x59   : > { %440 = vst [vmem:[%s915_s20 + $0x48] sm:$0xff] %v409_v0  ;;  %v357_v22 = vld [vmem:[%s898_s3 + $0x98] sm:$0xff]  ;;  %v388_v23 = vld [vmem:[%s905_s4 + $0x98] sm:$0xff]  ;;  %v417_v24 = vadd.f32 %v386_v17, %v355_v16  ;;  %v358_v25 = vld [vmem:[%s898_s3 + $0xa0] sm:$0xff]  ;;  %v418_v27 = vadd.f32 %v387_v20, %v356_v19 }
  0x5a   : > { %441 = vst [vmem:[%s915_s20 + $0x50] sm:$0xff] %v410_v3  ;;  %v389_v26 = vld [vmem:[%s905_s4 + $0xa0] sm:$0xff]  ;;  %v359_v28 = vld [vmem:[%s898_s3 + $0xa8] sm:$0xff]  ;;  %v390_v29 = vld [vmem:[%s905_s4 + $0xa8] sm:$0xff]  ;;  %v419_v30 = vadd.f32 %v388_v23, %v357_v22 }
  0x5b   : > { %442 = vst [vmem:[%s915_s20 + $0x58] sm:$0xff] %v411_v6  ;;  %v360_v31 = vld [vmem:[%s898_s3 + $0xb0] sm:$0xff]  ;;  %v391_v32 = vld [vmem:[%s905_s4 + $0xb0] sm:$0xff]  ;;  %v420_v33 = vadd.f32 %v389_v26, %v358_v25  ;;  %v361_v34 = vld [vmem:[%s898_s3 + $0xb8] sm:$0xff]  ;;  %v421_v36 = vadd.f32 %v390_v29, %v359_v28 }
  0x5c   : > { %443 = vst [vmem:[%s915_s20 + $0x60] sm:$0xff] %v412_v9  ;;  %v392_v35 = vld [vmem:[%s905_s4 + $0xb8] sm:$0xff]  ;;  %v362_v37 = vld [vmem:[%s898_s3 + $0xc0] sm:$0xff]  ;;  %v393_v38 = vld [vmem:[%s905_s4 + $0xc0] sm:$0xff]  ;;  %v422_v39 = vadd.f32 %v391_v32, %v360_v31 }
  0x5d   : > { %444 = vst [vmem:[%s915_s20 + $0x68] sm:$0xff] %v413_v12  ;;  %v363_v40 = vld [vmem:[%s898_s3 + $0xc8] sm:$0xff]  ;;  %v394_v41 = vld [vmem:[%s905_s4 + $0xc8] sm:$0xff]  ;;  %v423_v42 = vadd.f32 %v392_v35, %v361_v34  ;;  %v364_v43 = vld [vmem:[%s898_s3 + $0xd0] sm:$0xff]  ;;  %v424_v45 = vadd.f32 %v393_v38, %v362_v37 }
  0x5e   : > { %445 = vst [vmem:[%s915_s20 + $0x70] sm:$0xff] %v414_v15  ;;  %v395_v44 = vld [vmem:[%s905_s4 + $0xd0] sm:$0xff]  ;;  %v365_v46 = vld [vmem:[%s898_s3 + $0xd8] sm:$0xff]  ;;  %v396_v47 = vld [vmem:[%s905_s4 + $0xd8] sm:$0xff]  ;;  %v425_v48 = vadd.f32 %v394_v41, %v363_v40 }
  0x5f   : > { %446 = vst [vmem:[%s915_s20 + $0x78] sm:$0xff] %v415_v18  ;;  %v366_v49 = vld [vmem:[%s898_s3 + $0xe0] sm:$0xff]  ;;  %v397_v50 = vld [vmem:[%s905_s4 + $0xe0] sm:$0xff]  ;;  %v426_v51 = vadd.f32 %v395_v44, %v364_v43  ;;  %v367_v52 = vld [vmem:[%s898_s3 + $0xe8] sm:$0xff]  ;;  %v427_v54 = vadd.f32 %v396_v47, %v365_v46 }
  0x60   : > { %447 = vst [vmem:[%s915_s20 + $0x80] sm:$0xff] %v416_v21  ;;  %v398_v53 = vld [vmem:[%s905_s4 + $0xe8] sm:$0xff]  ;;  %v368_v55 = vld [vmem:[%s898_s3 + $0xf0] sm:$0x1f]  ;;  %v399_v56 = vld [vmem:[%s905_s4 + $0xf0] sm:$0x1f]  ;;  %v428_v57 = vadd.f32 %v397_v50, %v366_v49 }
  0x61   : > { %448 = vst [vmem:[%s915_s20 + $0x88] sm:$0xff] %v417_v24  ;;  %v429_v58 = vadd.f32 %v398_v53, %v367_v52  ;;  %v430_v59 = vadd.f32 %v399_v56, %v368_v55 }
  0x62   : > { %449 = vst [vmem:[%s915_s20 + $0x90] sm:$0xff] %v418_v27 }
  0x63   : > { %450 = vst [vmem:[%s915_s20 + $0x98] sm:$0xff] %v419_v30 }
  0x64   : > { %451 = vst [vmem:[%s915_s20 + $0xa0] sm:$0xff] %v420_v33 }
  0x65   : > { %452 = vst [vmem:[%s915_s20 + $0xa8] sm:$0xff] %v421_v36 }
  0x66   : > { %453 = vst [vmem:[%s915_s20 + $0xb0] sm:$0xff] %v422_v39 }
  0x67   : > { %454 = vst [vmem:[%s915_s20 + $0xb8] sm:$0xff] %v423_v42 }
  0x68   : > { %455 = vst [vmem:[%s915_s20 + $0xc0] sm:$0xff] %v424_v45 }
  0x69   : > { %456 = vst [vmem:[%s915_s20 + $0xc8] sm:$0xff] %v425_v48 }
  0x6a   : > { %457 = vst [vmem:[%s915_s20 + $0xd0] sm:$0xff] %v426_v51 }
  0x6b   : > { %458 = vst [vmem:[%s915_s20 + $0xd8] sm:$0xff] %v427_v54 }
  0x6c   : > { %459 = vst [vmem:[%s915_s20 + $0xe0] sm:$0xff] %v428_v57 }
  0x6d   : > { %460 = vst [vmem:[%s915_s20 + $0xe8] sm:$0xff] %v429_v58 }
  0x6e   : > { %461 = vst [vmem:[%s915_s20 + $0xf0] sm:$0x1f] %v430_v59 }
  0x6f   : > { %682 = shalt.err (!%p679_p2)
}
  0x70   : > { %s726_s24 = smov 128   ;;  %s727_s25 = smov 512  }
  0x71   : > { %s728_s29 = smov 8  }
  0x72   : > { %582 = dma.vmem_to_hbm [thread:$0]  (%p792_p9), %s475_s14, 3968, %s477_s16, %s463_s17, %s726_s24, %s727_s25, %s728_s29  }
  0x73 PF: > { %p588_p3 = scmp.ge.s32.totalorder %s721_s12, 2  ;;  %s491_s3 = sand.u32 1, %s709_s9  }
  0x74   : > { %s492_s4 = scalar_lea.sflag [#allocation4], %s491_s3 }
  0x75   : > { %p585_p4 = pnand %p588_p3, %p796_p10 }
  0x77   : > { %p586_p5 = pneg %p585_p4 }
  0x79   : > { %704 = dma.done.wait (%p586_p5), %s492_s4, 3968  }
  0x7a   : > { %706 = vsyncadd (%p586_p5), %s492_s4, 4294963328  ;;  %p15_p7 = scmp.ge.s32.totalorder %s769_s15, 6   ;;  %s1041_s9 = smov %s713_s10 }
  0x7b   : > { %s1042_s10 = smov %s717_s11  ;;  %s1043_s11 = smov %s781_s18 }
  0x7c   : > { %s1044_s12 = smov %s769_s15  ;;  %17 = sbr.rel (!%p15_p7) target bundleno = 5 (0x5), region = 119 }
  0x81   :  { %498 = vsyncpa [#allocation3], 1 }
  0x82   :  { %500 = vsyncpa [#allocation3 + $0x1], 1 }
  0x83   :  { %501 = vsyncpa [#allocation4], 1 }
  0x84   :  { %503 = vsyncpa [#allocation4 + $0x1], 1 }

</bundles_post_ra>
